<compile_context>
chip_gen: v6e
topology: v6e:2x2x1
jax: 0.10.0
libtpu: 0.0.40
codegen_flags: <defaults>
</compile_context>

<pallas_src>
import math

import jax
import jax.numpy as jnp
from jax.experimental import pallas as pl
from jax.experimental.pallas import tpu as pltpu


def _round_up(x, m):
    return ((x + m - 1) // m) * m


def conv_relu_pallas(x_nchw, w_oihw, *, th=8, out_dtype=None):
    """relu(conv2d(x, w, kernel=3, padding=1, bias=False)), NCHW in/out.

    x_nchw: (N, Cin, H, W) float32
    w_oihw: (Cout, Cin, 3, 3) float32
    th:     output rows per grid step (tune per chip VMEM; 8 is a safe default)
    """
    N, Cin, H, W = x_nchw.shape
    Cout = w_oihw.shape[0]
    assert w_oihw.shape == (Cout, Cin, 3, 3)
    out_dtype = x_nchw.dtype if out_dtype is None else out_dtype

    th = int(max(1, min(th, 128)))
    Hp = _round_up(H, th)                 # pad H to a multiple of th (no th=H fallback)
    n_h = Hp // th
    lane_quant = 128 // math.gcd(th, 128)
    wr = _round_up(W + 2, lane_quant)     # wide row: 1-px halo each side + lane quantum
    lt = th * wr                          # flat output tile length (multiple of 128)
    lp = (th + 2) * wr                    # flat halo'd input window length
    l_win = _round_up(lp + 2, 128)        # DMA window (covers the largest tap shift)

    bf16 = jnp.bfloat16

    # -------- wrapper-side layout prep: ONE zero-halo pad, no duplication -----
    xb = x_nchw.astype(bf16)
    x_pad = jnp.pad(xb, ((0, 0), (0, 0), (1, 1 + Hp - H), (1, wr - W - 1)))
    x_flat = x_pad.reshape(N, Cin, (Hp + 2) * wr)
    x_flat = jnp.pad(x_flat, ((0, 0), (0, 0), (0, l_win - lp)))   # DMA overrun pad

    # Resident flat weight tile: w2[co, (kh*3+kw)*Cin + ci] = w[co, ci, kh, kw].
    w2 = jnp.transpose(w_oihw, (0, 2, 3, 1)).reshape(Cout, 9 * Cin).astype(bf16)

    def kernel(x_hbm, w_ref, o_ref, xbuf, col, sem):
        # x_hbm: (N, Cin, flat)   bf16, raw HBM ref (memory_space=pl.ANY)
        # w_ref: (Cout, 9*Cin)    bf16, resident VMEM weights
        # o_ref: (1, Cout, lt)    bf16, lane-dense flattened NCHW output tile
        # xbuf : (2, Cin, l_win)  bf16, double-buffered halo'd row window
        # col  : (9*Cin, lt)      bf16, im2col scratch
        n = pl.program_id(0)
        j = pl.program_id(1)
        slot = j & 1

        def window_copy(jb, sl):
            start = pl.multiple_of(jb * lt, 128)
            return pltpu.make_async_copy(
                x_hbm.at[n, :, pl.ds(start, l_win)], xbuf.at[sl], sem.at[sl])

        @pl.when(j == 0)                       # prime this image's first window
        def _():
            window_copy(j, slot).start()

        window_copy(j, slot).wait()            # window for (n, j) is ready

        @pl.when(j + 1 < pl.num_programs(1))   # prefetch the next row block
        def _():
            window_copy(j + 1, 1 - slot).start()

        # im2col build: 9 static lane-offset Ref slices -> one K=9*Cin matmul.
        # (Further micro-opt: route the lane shifts through pltpu.roll / XLU.)
        xcur = xbuf.at[slot]
        for kh in range(3):
            for kw in range(3):
                t = kh * 3 + kw
                off = kh * wr + kw
                col[t * Cin:(t + 1) * Cin, :] = xcur[:, off:off + lt]

        acc = jnp.dot(w_ref[...], col[...], preferred_element_type=jnp.float32)
        o_ref[0, :, :] = jnp.maximum(acc, 0.0).astype(o_ref.dtype)

    # VMEM-aware limit (scratches + resident weights + double-buffered output).
    vmem_need = (2 * Cin * l_win * 2        # xbuf
                 + 9 * Cin * lt * 2         # im2col scratch
                 + 2 * Cout * 9 * Cin * 2   # weights (pipeline double-buffer)
                 + 2 * Cout * lt * 2)       # output block (pipeline double-buffer)
    vmem_limit = int(min(max(4 * vmem_need, 16 * 2**20), 48 * 2**20))

    out_wide = pl.pallas_call(
        kernel,
        out_shape=jax.ShapeDtypeStruct((N, Cout, Hp * wr), bf16),
        grid_spec=pltpu.PrefetchScalarGridSpec(
            num_scalar_prefetch=0,
            grid=(N, n_h),
            in_specs=[
                pl.BlockSpec(memory_space=pl.ANY),                    # raw HBM x
                pl.BlockSpec((Cout, 9 * Cin), lambda n, j: (0, 0)),   # resident w
            ],
            out_specs=pl.BlockSpec((1, Cout, lt), lambda n, j: (n, 0, j)),
            scratch_shapes=[
                pltpu.VMEM((2, Cin, l_win), bf16),
                pltpu.VMEM((9 * Cin, lt), bf16),
                pltpu.SemaphoreType.DMA((2,)),
            ]),
        compiler_params=pltpu.CompilerParams(
            dimension_semantics=("parallel", "arbitrary"),
            vmem_limit_bytes=vmem_limit),
    )(x_flat, w2)

    # Drop width/height padding: contiguous reshape + slice (+ cast), no transpose.
    out = out_wide.reshape(N, Cout, Hp, wr)[:, :, :H, :W]
    return out.astype(out_dtype)


if __name__ == "__main__":
    N, Cin, Cout, H, W = 2, 4, 8, 16, 16
    key = jax.random.PRNGKey(0)
    kx, kw = jax.random.split(key)
    x = jax.random.normal(kx, (N, Cin, H, W), dtype=jnp.float32)
    w = jax.random.normal(kw, (Cout, Cin, 3, 3), dtype=jnp.float32) * 0.1

    fn = jax.jit(conv_relu_pallas)
    out = jax.block_until_ready(fn(x, w))
    assert out.shape == (N, Cout, H, W)
    assert out.dtype == x.dtype

    # Reference: same bf16-quantized operands, f32 accumulation, ReLU.
    xq = x.astype(jnp.bfloat16).astype(jnp.float32)
    wq = w.astype(jnp.bfloat16).astype(jnp.float32)
    ref = jax.lax.conv_general_dilated(
        xq, wq, window_strides=(1, 1), padding="SAME",
        dimension_numbers=("NCHW", "OIHW", "NCHW"),
        precision=jax.lax.Precision.HIGHEST)
    ref = jnp.maximum(ref, 0.0)
    err = float(jnp.max(jnp.abs(out - ref)))
    assert jnp.allclose(out, ref, atol=2e-2, rtol=2e-2), err

    print("KERNEL_OK")
</pallas_src>

<mosaic_0001>
module attributes {stable_mosaic.version = 11 : i64} {
  func.func @kernel(%arg0: i32, %arg1: i32, %arg2: memref<2x4x640xbf16, #tpu.memory_space<any>>, %arg3: memref<8x36xbf16, #tpu.memory_space<vmem>>, %arg4: memref<1x8x256xbf16, #tpu.memory_space<vmem>>, %arg5: memref<2x4x384xbf16, #tpu.memory_space<vmem>>, %arg6: memref<36x256xbf16, #tpu.memory_space<vmem>>, %arg7: memref<2x!tpu.dma_semaphore, #tpu.memory_space<semaphore_mem>>) attributes {dimension_semantics = [#tpu.dimension_semantics<parallel>, #tpu.dimension_semantics<arbitrary>], iteration_bounds = array<i64: 2, 2>, scalar_prefetch = 0 : i64, scratch_operands = 3 : i64, tpu.core_type = #tpu.core_type<tc>, window_params = [{}, {pipeline_mode = #tpu.pipeline_mode<synchronous>, transform_indices = @transform_1, window_bounds = array<i64: 8, 36>}, {transform_indices = @transform_2, window_bounds = array<i64: 1, 8, 256>}]} {
    %c1_i32 = arith.constant 1 : i32
    %0 = arith.andi %arg1, %c1_i32 : i32
    %c0_i32 = arith.constant 0 : i32
    %1 = arith.cmpi eq, %arg1, %c0_i32 : i32
    %2 = arith.extui %1 : i1 to i32
    %c0_i32_0 = arith.constant 0 : i32
    %3 = arith.cmpi ne, %2, %c0_i32_0 : i32
    scf.if %3 {
      %c256_i32_52 = arith.constant 256 : i32
      %61 = arith.muli %arg1, %c256_i32_52 : i32
      %62 = tpu.assume_multiple %61, 128 : i32
      %c0_i32_53 = arith.constant 0 : i32
      %63 = tpu.memref_slice %arg2[%arg0, %c0_i32_53, %62] : memref<2x4x640xbf16, #tpu.memory_space<any>> -> memref<1x4x384xbf16, #tpu.memory_space<any>>
      %64 = tpu.memref_squeeze %63 : memref<1x4x384xbf16, #tpu.memory_space<any>> -> memref<4x384xbf16, #tpu.memory_space<any>>
      %c0_i32_54 = arith.constant 0 : i32
      %c0_i32_55 = arith.constant 0 : i32
      %65 = tpu.memref_slice %arg5[%0, %c0_i32_54, %c0_i32_55] : memref<2x4x384xbf16, #tpu.memory_space<vmem>> -> memref<1x4x384xbf16, #tpu.memory_space<vmem>>
      %66 = tpu.memref_squeeze %65 : memref<1x4x384xbf16, #tpu.memory_space<vmem>> -> memref<4x384xbf16, #tpu.memory_space<vmem>>
      %67 = tpu.memref_slice %arg7[%0] : memref<2x!tpu.dma_semaphore, #tpu.memory_space<semaphore_mem>> -> memref<1x!tpu.dma_semaphore, #tpu.memory_space<semaphore_mem>>
      %68 = tpu.memref_squeeze %67 : memref<1x!tpu.dma_semaphore, #tpu.memory_space<semaphore_mem>> -> memref<!tpu.dma_semaphore, #tpu.memory_space<semaphore_mem>>
      tpu.enqueue_dma source(%64 : memref<4x384xbf16, #tpu.memory_space<any>>) target(%66 : memref<4x384xbf16, #tpu.memory_space<vmem>>) target_semaphore(%68 : memref<!tpu.dma_semaphore, #tpu.memory_space<semaphore_mem>>)
    } else {
    }
    %c256_i32 = arith.constant 256 : i32
    %4 = arith.muli %arg1, %c256_i32 : i32
    %5 = tpu.assume_multiple %4, 128 : i32
    %c0_i32_1 = arith.constant 0 : i32
    %6 = tpu.memref_slice %arg2[%arg0, %c0_i32_1, %5] : memref<2x4x640xbf16, #tpu.memory_space<any>> -> memref<1x4x384xbf16, #tpu.memory_space<any>>
    %7 = tpu.memref_squeeze %6 : memref<1x4x384xbf16, #tpu.memory_space<any>> -> memref<4x384xbf16, #tpu.memory_space<any>>
    %c0_i32_2 = arith.constant 0 : i32
    %c0_i32_3 = arith.constant 0 : i32
    %8 = tpu.memref_slice %arg5[%0, %c0_i32_2, %c0_i32_3] : memref<2x4x384xbf16, #tpu.memory_space<vmem>> -> memref<1x4x384xbf16, #tpu.memory_space<vmem>>
    %9 = tpu.memref_squeeze %8 : memref<1x4x384xbf16, #tpu.memory_space<vmem>> -> memref<4x384xbf16, #tpu.memory_space<vmem>>
    %10 = tpu.memref_slice %arg7[%0] : memref<2x!tpu.dma_semaphore, #tpu.memory_space<semaphore_mem>> -> memref<1x!tpu.dma_semaphore, #tpu.memory_space<semaphore_mem>>
    %11 = tpu.memref_squeeze %10 : memref<1x!tpu.dma_semaphore, #tpu.memory_space<semaphore_mem>> -> memref<!tpu.dma_semaphore, #tpu.memory_space<semaphore_mem>>
    tpu.wait_dma2 semaphore(%11 : memref<!tpu.dma_semaphore, #tpu.memory_space<semaphore_mem>>) src(%7 : memref<4x384xbf16, #tpu.memory_space<any>>) dst(%9 : memref<4x384xbf16, #tpu.memory_space<vmem>>)
    %c1_i32_4 = arith.constant 1 : i32
    %12 = arith.addi %arg1, %c1_i32_4 : i32
    %c2_i32 = arith.constant 2 : i32
    %13 = arith.cmpi slt, %12, %c2_i32 : i32
    %14 = arith.extui %13 : i1 to i32
    %c0_i32_5 = arith.constant 0 : i32
    %15 = arith.cmpi ne, %14, %c0_i32_5 : i32
    scf.if %15 {
      %c1_i32_52 = arith.constant 1 : i32
      %61 = arith.addi %arg1, %c1_i32_52 : i32
      %c1_i32_53 = arith.constant 1 : i32
      %62 = arith.subi %c1_i32_53, %0 : i32
      %c256_i32_54 = arith.constant 256 : i32
      %63 = arith.muli %61, %c256_i32_54 : i32
      %64 = tpu.assume_multiple %63, 128 : i32
      %c0_i32_55 = arith.constant 0 : i32
      %65 = tpu.memref_slice %arg2[%arg0, %c0_i32_55, %64] : memref<2x4x640xbf16, #tpu.memory_space<any>> -> memref<1x4x384xbf16, #tpu.memory_space<any>>
      %66 = tpu.memref_squeeze %65 : memref<1x4x384xbf16, #tpu.memory_space<any>> -> memref<4x384xbf16, #tpu.memory_space<any>>
      %c0_i32_56 = arith.constant 0 : i32
      %c0_i32_57 = arith.constant 0 : i32
      %67 = tpu.memref_slice %arg5[%62, %c0_i32_56, %c0_i32_57] : memref<2x4x384xbf16, #tpu.memory_space<vmem>> -> memref<1x4x384xbf16, #tpu.memory_space<vmem>>
      %68 = tpu.memref_squeeze %67 : memref<1x4x384xbf16, #tpu.memory_space<vmem>> -> memref<4x384xbf16, #tpu.memory_space<vmem>>
      %69 = tpu.memref_slice %arg7[%62] : memref<2x!tpu.dma_semaphore, #tpu.memory_space<semaphore_mem>> -> memref<1x!tpu.dma_semaphore, #tpu.memory_space<semaphore_mem>>
      %70 = tpu.memref_squeeze %69 : memref<1x!tpu.dma_semaphore, #tpu.memory_space<semaphore_mem>> -> memref<!tpu.dma_semaphore, #tpu.memory_space<semaphore_mem>>
      tpu.enqueue_dma source(%66 : memref<4x384xbf16, #tpu.memory_space<any>>) target(%68 : memref<4x384xbf16, #tpu.memory_space<vmem>>) target_semaphore(%70 : memref<!tpu.dma_semaphore, #tpu.memory_space<semaphore_mem>>)
    } else {
    }
    %c0_i32_6 = arith.constant 0 : i32
    %c0_i32_7 = arith.constant 0 : i32
    %16 = tpu.memref_slice %arg5[%0, %c0_i32_6, %c0_i32_7] : memref<2x4x384xbf16, #tpu.memory_space<vmem>> -> memref<1x4x384xbf16, #tpu.memory_space<vmem>>
    %17 = tpu.memref_squeeze %16 : memref<1x4x384xbf16, #tpu.memory_space<vmem>> -> memref<4x384xbf16, #tpu.memory_space<vmem>>
    %c0 = arith.constant 0 : index
    %c0_8 = arith.constant 0 : index
    %18 = vector.load %17[%c0, %c0_8] : memref<4x384xbf16, #tpu.memory_space<vmem>>, vector<4x256xbf16>
    %c0_9 = arith.constant 0 : index
    %c0_10 = arith.constant 0 : index
    %19 = vector.load %arg6[%c0_9, %c0_10] : memref<36x256xbf16, #tpu.memory_space<vmem>>, vector<4x256xbf16>
    tpu.vector_store %arg6[%c0_9, %c0_10], %18 {strides = array<i32>} : memref<36x256xbf16, #tpu.memory_space<vmem>>, vector<4x256xbf16>,
    %c0_i32_11 = arith.constant 0 : i32
    %c0_i32_12 = arith.constant 0 : i32
    %20 = tpu.memref_slice %arg5[%0, %c0_i32_11, %c0_i32_12] : memref<2x4x384xbf16, #tpu.memory_space<vmem>> -> memref<1x4x384xbf16, #tpu.memory_space<vmem>>
    %21 = tpu.memref_squeeze %20 : memref<1x4x384xbf16, #tpu.memory_space<vmem>> -> memref<4x384xbf16, #tpu.memory_space<vmem>>
    %c0_13 = arith.constant 0 : index
    %c1 = arith.constant 1 : index
    %22 = vector.load %21[%c0_13, %c1] : memref<4x384xbf16, #tpu.memory_space<vmem>>, vector<4x256xbf16>
    %c4 = arith.constant 4 : index
    %c0_14 = arith.constant 0 : index
    %23 = vector.load %arg6[%c4, %c0_14] : memref<36x256xbf16, #tpu.memory_space<vmem>>, vector<4x256xbf16>
    tpu.vector_store %arg6[%c4, %c0_14], %22 {strides = array<i32>} : memref<36x256xbf16, #tpu.memory_space<vmem>>, vector<4x256xbf16>,
    %c0_i32_15 = arith.constant 0 : i32
    %c0_i32_16 = arith.constant 0 : i32
    %24 = tpu.memref_slice %arg5[%0, %c0_i32_15, %c0_i32_16] : memref<2x4x384xbf16, #tpu.memory_space<vmem>> -> memref<1x4x384xbf16, #tpu.memory_space<vmem>>
    %25 = tpu.memref_squeeze %24 : memref<1x4x384xbf16, #tpu.memory_space<vmem>> -> memref<4x384xbf16, #tpu.memory_space<vmem>>
    %c0_17 = arith.constant 0 : index
    %c2 = arith.constant 2 : index
    %26 = vector.load %25[%c0_17, %c2] : memref<4x384xbf16, #tpu.memory_space<vmem>>, vector<4x256xbf16>
    %c8 = arith.constant 8 : index
    %c0_18 = arith.constant 0 : index
    %27 = vector.load %arg6[%c8, %c0_18] : memref<36x256xbf16, #tpu.memory_space<vmem>>, vector<4x256xbf16>
    tpu.vector_store %arg6[%c8, %c0_18], %26 {strides = array<i32>} : memref<36x256xbf16, #tpu.memory_space<vmem>>, vector<4x256xbf16>,
    %c0_i32_19 = arith.constant 0 : i32
    %c0_i32_20 = arith.constant 0 : i32
    %28 = tpu.memref_slice %arg5[%0, %c0_i32_19, %c0_i32_20] : memref<2x4x384xbf16, #tpu.memory_space<vmem>> -> memref<1x4x384xbf16, #tpu.memory_space<vmem>>
    %29 = tpu.memref_squeeze %28 : memref<1x4x384xbf16, #tpu.memory_space<vmem>> -> memref<4x384xbf16, #tpu.memory_space<vmem>>
    %c0_21 = arith.constant 0 : index
    %c32 = arith.constant 32 : index
    %30 = vector.load %29[%c0_21, %c32] : memref<4x384xbf16, #tpu.memory_space<vmem>>, vector<4x256xbf16>
    %c12 = arith.constant 12 : index
    %c0_22 = arith.constant 0 : index
    %31 = vector.load %arg6[%c12, %c0_22] : memref<36x256xbf16, #tpu.memory_space<vmem>>, vector<4x256xbf16>
    tpu.vector_store %arg6[%c12, %c0_22], %30 {strides = array<i32>} : memref<36x256xbf16, #tpu.memory_space<vmem>>, vector<4x256xbf16>,
    %c0_i32_23 = arith.constant 0 : i32
    %c0_i32_24 = arith.constant 0 : i32
    %32 = tpu.memref_slice %arg5[%0, %c0_i32_23, %c0_i32_24] : memref<2x4x384xbf16, #tpu.memory_space<vmem>> -> memref<1x4x384xbf16, #tpu.memory_space<vmem>>
    %33 = tpu.memref_squeeze %32 : memref<1x4x384xbf16, #tpu.memory_space<vmem>> -> memref<4x384xbf16, #tpu.memory_space<vmem>>
    %c0_25 = arith.constant 0 : index
    %c33 = arith.constant 33 : index
    %34 = vector.load %33[%c0_25, %c33] : memref<4x384xbf16, #tpu.memory_space<vmem>>, vector<4x256xbf16>
    %c16 = arith.constant 16 : index
    %c0_26 = arith.constant 0 : index
    %35 = vector.load %arg6[%c16, %c0_26] : memref<36x256xbf16, #tpu.memory_space<vmem>>, vector<4x256xbf16>
    tpu.vector_store %arg6[%c16, %c0_26], %34 {strides = array<i32>} : memref<36x256xbf16, #tpu.memory_space<vmem>>, vector<4x256xbf16>,
    %c0_i32_27 = arith.constant 0 : i32
    %c0_i32_28 = arith.constant 0 : i32
    %36 = tpu.memref_slice %arg5[%0, %c0_i32_27, %c0_i32_28] : memref<2x4x384xbf16, #tpu.memory_space<vmem>> -> memref<1x4x384xbf16, #tpu.memory_space<vmem>>
    %37 = tpu.memref_squeeze %36 : memref<1x4x384xbf16, #tpu.memory_space<vmem>> -> memref<4x384xbf16, #tpu.memory_space<vmem>>
    %c0_29 = arith.constant 0 : index
    %c34 = arith.constant 34 : index
    %38 = vector.load %37[%c0_29, %c34] : memref<4x384xbf16, #tpu.memory_space<vmem>>, vector<4x256xbf16>
    %c20 = arith.constant 20 : index
    %c0_30 = arith.constant 0 : index
    %39 = vector.load %arg6[%c20, %c0_30] : memref<36x256xbf16, #tpu.memory_space<vmem>>, vector<4x256xbf16>
    tpu.vector_store %arg6[%c20, %c0_30], %38 {strides = array<i32>} : memref<36x256xbf16, #tpu.memory_space<vmem>>, vector<4x256xbf16>,
    %c0_i32_31 = arith.constant 0 : i32
    %c0_i32_32 = arith.constant 0 : i32
    %40 = tpu.memref_slice %arg5[%0, %c0_i32_31, %c0_i32_32] : memref<2x4x384xbf16, #tpu.memory_space<vmem>> -> memref<1x4x384xbf16, #tpu.memory_space<vmem>>
    %41 = tpu.memref_squeeze %40 : memref<1x4x384xbf16, #tpu.memory_space<vmem>> -> memref<4x384xbf16, #tpu.memory_space<vmem>>
    %c0_33 = arith.constant 0 : index
    %c64 = arith.constant 64 : index
    %42 = vector.load %41[%c0_33, %c64] : memref<4x384xbf16, #tpu.memory_space<vmem>>, vector<4x256xbf16>
    %c24 = arith.constant 24 : index
    %c0_34 = arith.constant 0 : index
    %43 = vector.load %arg6[%c24, %c0_34] : memref<36x256xbf16, #tpu.memory_space<vmem>>, vector<4x256xbf16>
    tpu.vector_store %arg6[%c24, %c0_34], %42 {strides = array<i32>} : memref<36x256xbf16, #tpu.memory_space<vmem>>, vector<4x256xbf16>,
    %c0_i32_35 = arith.constant 0 : i32
    %c0_i32_36 = arith.constant 0 : i32
    %44 = tpu.memref_slice %arg5[%0, %c0_i32_35, %c0_i32_36] : memref<2x4x384xbf16, #tpu.memory_space<vmem>> -> memref<1x4x384xbf16, #tpu.memory_space<vmem>>
    %45 = tpu.memref_squeeze %44 : memref<1x4x384xbf16, #tpu.memory_space<vmem>> -> memref<4x384xbf16, #tpu.memory_space<vmem>>
    %c0_37 = arith.constant 0 : index
    %c65 = arith.constant 65 : index
    %46 = vector.load %45[%c0_37, %c65] : memref<4x384xbf16, #tpu.memory_space<vmem>>, vector<4x256xbf16>
    %c28 = arith.constant 28 : index
    %c0_38 = arith.constant 0 : index
    %47 = vector.load %arg6[%c28, %c0_38] : memref<36x256xbf16, #tpu.memory_space<vmem>>, vector<4x256xbf16>
    tpu.vector_store %arg6[%c28, %c0_38], %46 {strides = array<i32>} : memref<36x256xbf16, #tpu.memory_space<vmem>>, vector<4x256xbf16>,
    %c0_i32_39 = arith.constant 0 : i32
    %c0_i32_40 = arith.constant 0 : i32
    %48 = tpu.memref_slice %arg5[%0, %c0_i32_39, %c0_i32_40] : memref<2x4x384xbf16, #tpu.memory_space<vmem>> -> memref<1x4x384xbf16, #tpu.memory_space<vmem>>
    %49 = tpu.memref_squeeze %48 : memref<1x4x384xbf16, #tpu.memory_space<vmem>> -> memref<4x384xbf16, #tpu.memory_space<vmem>>
    %c0_41 = arith.constant 0 : index
    %c66 = arith.constant 66 : index
    %50 = vector.load %49[%c0_41, %c66] : memref<4x384xbf16, #tpu.memory_space<vmem>>, vector<4x256xbf16>
    %c32_42 = arith.constant 32 : index
    %c0_43 = arith.constant 0 : index
    %51 = vector.load %arg6[%c32_42, %c0_43] : memref<36x256xbf16, #tpu.memory_space<vmem>>, vector<4x256xbf16>
    tpu.vector_store %arg6[%c32_42, %c0_43], %50 {strides = array<i32>} : memref<36x256xbf16, #tpu.memory_space<vmem>>, vector<4x256xbf16>,
    %c0_44 = arith.constant 0 : index
    %c0_45 = arith.constant 0 : index
    %52 = vector.load %arg3[%c0_44, %c0_45] : memref<8x36xbf16, #tpu.memory_space<vmem>>, vector<8x36xbf16>
    %c0_46 = arith.constant 0 : index
    %c0_47 = arith.constant 0 : index
    %53 = vector.load %arg6[%c0_46, %c0_47] : memref<36x256xbf16, #tpu.memory_space<vmem>>, vector<36x256xbf16>
    %cst = arith.constant dense<0.000000e+00> : vector<8x256xf32>
    %54 = tpu.matmul %52, %53, %cst {dimension_numbers = #tpu.dot_dimension_numbers<[1], [0], [0], [1], [0, 0, 1, 1], [], []>} : vector<8x36xbf16>, vector<36x256xbf16>, vector<8x256xf32> -> vector<8x256xf32>
    %cst_48 = arith.constant 0.000000e+00 : f32
    %55 = vector.broadcast %cst_48 : f32 to vector<8x256xf32>
    %56 = arith.maximumf %54, %55 : vector<8x256xf32>
    %57 = arith.truncf %56 : vector<8x256xf32> to vector<8x256xbf16>
    %c0_49 = arith.constant 0 : index
    %c0_50 = arith.constant 0 : index
    %c0_51 = arith.constant 0 : index
    %58 = vector.load %arg4[%c0_49, %c0_50, %c0_51] : memref<1x8x256xbf16, #tpu.memory_space<vmem>>, vector<1x8x256xbf16>
    %59 = vector.shape_cast %58 : vector<1x8x256xbf16> to vector<8x256xbf16>
    %60 = vector.shape_cast %57 : vector<8x256xbf16> to vector<1x8x256xbf16>
    tpu.vector_store %arg4[%c0_49, %c0_50, %c0_51], %60 {strides = array<i32>} : memref<1x8x256xbf16, #tpu.memory_space<vmem>>, vector<1x8x256xbf16>,
    return
  }
  func.func @transform_1(%arg0: i32, %arg1: i32) -> (i32, i32) {
    %c0_i32 = arith.constant 0 : i32
    %c0_i32_0 = arith.constant 0 : i32
    %c0_i32_1 = arith.constant 0 : i32
    return %c0_i32, %c0_i32_0 : i32, i32
  }
  func.func @transform_2(%arg0: i32, %arg1: i32) -> (i32, i32, i32) {
    %c0_i32 = arith.constant 0 : i32
    %c0_i32_0 = arith.constant 0 : i32
    return %arg0, %c0_i32, %arg1 : i32, i32, i32
  }
}

</mosaic_0001>

<bundles_post_ra>
// kernel: conv_relu_pallas.1
= control target key start
LH: loop header
LB: loop body
LE: loop exit
PB: predicated region body
PF: predicated region fallthrough
CT: control target
= control target key end

     0   :  { %s877_s9 = smov 0   ;;  %s879_s10 = smov 0   ;;  %s977_s0 = inlined_call_operand.vmem [shape: bf16[2,4,640], index: 0, kind: input, shape index: {}]   ;;  %s978_s1 = inlined_call_operand.vmem [shape: bf16[8,36], index: 1, kind: input, shape index: {}]   ;;  %s979_s2 = inlined_call_operand.vmem [shape: bf16[2,8,512], index: 2, kind: output, shape index: {}]  }
   0x1   :  { %s881_s11 = smov 0   ;;  %s883_s12 = smov 0  }
   0x2   :  { %s885_s13 = smov 0  }
   0x3 LB: > { %s21_s14 = sadd.s32 1, %s842_s11  ;;  %s24_s15 = sadd.s32 1, %s846_s12  ;;  %s850_s13 = sphi %s885_s13, %s12_s13   ;;  %s846_s12 = sphi %s883_s12, %s983_s12   ;;  %s842_s11 = sphi %s881_s11, %s982_s11   ;;  %s838_s10 = sphi %s879_s10, %s981_s10   ;;  %s834_s9 = sphi %s877_s9, %s980_s9  }
   0x4   : > { %p22_p0 = scmp.ge.s32.totalorder %s21_s14, 2  ;;  %p711_p1 = scmp.ge.s32.totalorder %s850_s13, 1 }
   0x5   : > { %p92_p2 = scmp.lt.s32.totalorder %s850_s13, 5 }
   0x6   : > { %s985_s14 = smov (%p22_p0, %s21_s14), 0  ;;  %s987_s15 = smov (!%p22_p0, %s24_s15), %s846_s12 }
   0x7   : > { %p93_p3 = pnand %p711_p1, %p92_p2  ;;  %p26_p4 = scmp.ge.s32.totalorder %s987_s15, 2 }
   0x8   : > { %s712_s16 = sshll.u32 (!%p93_p3), %s834_s9, 1  ;;  %p112_p5 = scmp.lt.s32.totalorder (!%p93_p3), %s838_s10, 1 }
   0x9   : > { %s989_s15 = smov (%p26_p4, %s987_s15), 0  ;;  %96 = sbr.rel (%p93_p3) target bundleno = 410 (0x19a), region = 24 }
   0xa   : > { %p114_p6 = scmp.lt.s32.totalorder (!%p93_p3), %s712_s16, 3  ;;  %s914_s17 = sand.u32 (!%p93_p3), 1, %s834_s9 }
   0xb   : > { %p715_p7 = scmp.ne.s32.totalorder (!%p93_p3), %s834_s9, 0 }
   0xe   : > { %s113_s18 = scalar_select %p112_p5, %s838_s10, 1 }
   0xf   : > { %s991_s16 = smov (!%p114_p6, %s712_s16), 3  ;;  %126 = sbr.rel (%p715_p7) target bundleno = 26 (0x1a), region = 28 }
  0x10   : > { %s713_s19 = sshll.u32 %s113_s18, 2  ;;  %s716_s25 = sshll.u32 (!%p715_p7), %s834_s9, 8 }
  0x11   : > { %s117_s20 = sadd.s32 %s713_s19, %s991_s16  ;;  %s130_s26 = smul.u32 (!%p715_p7), 5, %s838_s10 }
  0x12   : > { %s714_s21 = sshll.u32 %s117_s20, 2  ;;  %s128_s27 = sshra.s32 (!%p715_p7), %s716_s25, 7 }
  0x13   : > { %s920_s24 = scalar_lea.vmem %s979_s2, %s714_s21  ;;  %s738_s28 = smul.u32 (!%p715_p7), 6, %s914_s17 }
  0x14   : > { %s131_s29 = sadd.s32 %s130_s26, %s128_s27  ;;  %s137_s7 = scalar_lea.sflag [#allocation4], %s914_s17 }
  0x15   : > { %s717_s30 = sshll.u32 %s131_s29, 1  ;;  %s136_s6 = scalar_lea.vmem [#allocation2], %s738_s28 }
  0x16   : > { %s133_s5 = scalar_lea.vmem %s977_s0, %s717_s30 }
  0x17   : > { %v156_v0 = vld [vmem:[%s133_s5] sm:$0x3f] }
  0x18   : > { %157 = vst [vmem:[%s136_s6] sm:$0x3f] %v156_v0 }
  0x19   : > { %183 = vsyncadd %s137_s7, 96 }
  0x1a PF: > { %s739_s8 = smul.u32 6, %s914_s17  ;;  %s188_s18 = scalar_lea.sflag [#allocation4], %s914_s17 }
  0x1c   : > { %s931_s16 = scalar_lea.vmem [#allocation2], %s739_s8 }
  0x1d   : > { %830 = dma.done.wait %s188_s18, 96 }
  0x1e   : > { %831 = vsyncadd %s188_s18, 4294967200  ;;  %s193_s19 = sadd.s32 1, %s834_s9 }
  0x1f   : > { %p720_p8 = scmp.ge.s32.totalorder %s193_s19, 2 }
  0x20   : > { %s198_s20 = ssub.s32 (!%p720_p8), 1, %s914_s17  ;;  %s740_s21 = sshll.u32 (!%p720_p8), %s834_s9, 8 }
  0x21   : > { %197 = sbr.rel (%p720_p8) target bundleno = 42 (0x2a), region = 62  ;;  %s741_s22 = sadd.s32 (!%p720_p8), 256, %s740_s21 }
  0x22   : > { %s202_s23 = smul.u32 (!%p720_p8), 5, %s838_s10  ;;  %s200_s25 = sshra.s32 (!%p720_p8), %s741_s22, 7 }
  0x23   : > { %s742_s26 = smul.u32 (!%p720_p8), 6, %s198_s20  ;;  %s209_s5 = scalar_lea.sflag (!%p720_p8), [#allocation4], %s198_s20 }
  0x24   : > { %s203_s27 = sadd.s32 (!%p720_p8), %s202_s23, %s200_s25 }
  0x25   : > { %s722_s28 = sshll.u32 (!%p720_p8), %s203_s27, 1  ;;  %s208_s4 = scalar_lea.vmem (!%p720_p8), [#allocation2], %s742_s26 }
  0x26   : > { %s205_s3 = scalar_lea.vmem %s977_s0, %s722_s28 }
  0x27   : > { %v228_v1 = vld [vmem:[%s205_s3] sm:$0x3f] }
  0x28   : > { %229 = vst [vmem:[%s208_s4] sm:$0x3f] %v228_v1 }
  0x29   : > { %255 = vsyncadd %s209_s5, 96 }
  0x2a PF: > { %v273_v2 = vlaneseq  ;;  %v852_v3 = vmov 1983009808   ;;  %s853_s9 = smov 62   ;;  %s854_s10 = smov 95   ;;  %v861_v41 = vmov 0   ;;  %vm290_vm0 = vcmask 1043456  }
  0x2b   : > { %v271_v4 = vunpack.c.l.s4 %v852_v3  ;;  %s855_s17 = smov 94   ;;  %s856_s6 = smov 64   ;;  %566 = vmatprep.mubr.bf16.mxu0 %v861_v41  ;;  %vm488_vm1 = vcmask 506880   ;;  %vm376_vm2 = vcmask 777216   ;;  %vm404_vm3 = vcmask 769024  }
  0x2c   : > { %v274_v5 = vshrl.u32 %v273_v2, 7  ;;  %s857_s7 = smov 63   ;;  %s858_s8 = smov 127   ;;  %vm432_vm4 = vcmask 523264   ;;  %vm460_vm5 = vcmask 515072   ;;  %vm527_vm6 = vcmask 1041408  }
  0x2d   : > { %v272_v6 = vunpack.c.0.s8 %v271_v4  ;;  %s859_s18 = smov 126   ;;  %s860_s19 = smov 96   ;;  %vm292_vm7 = vcmask 1039360   ;;  %vm320_vm8 = vcmask 1031168   ;;  %vm348_vm9 = vcmask 785408  }
  0x2e   : > { %vm523_vm10 = vcmask 293888  }
  0x2f   : > { %v464_v7 = vld [vmem:[%s931_s16] sm:$0x3f]  ;;  %v275_v9 = vsub.s32 %v272_v6, %v274_v5 }
  0x30   : > { %v352_v8 = vld [vmem:[%s931_s16] sm:$0x3f]  ;;  %v466_v10 = vcombine.high %v464_v7, %v464_v7 }
  0x31   : > { %v354_v11 = vcombine.high %v352_v8, %v352_v8  ;;  %v380_v12 = vld [vmem:[%s931_s16] sm:$0x3f]  ;;  %v473_v13 = vrot.slane %v464_v7, %v275_v9  ;;  %v361_v14 = vrot.slane %v352_v8, %v275_v9 }
  0x32   : > { %v480_v15 = vrot.slane %v466_v10, %v275_v9  ;;  %v382_v17 = vcombine.low %v380_v12, %v380_v12  ;;  %v408_v18 = vld [vmem:[%s931_s16] sm:$0x3f]  ;;  %v396_v20 = vrot.slane %v380_v12, %v275_v9 }
  0x33   : > { %481 = vrot.lane.b32.xlu0 %v473_v13, %s853_s9  ;;  %369 = vrot.lane.b32.xlu1 %v361_v14, %s854_s10  ;;  %v368_v16 = vrot.slane %v354_v11, %v275_v9  ;;  %v410_v21 = vcombine.high %v408_v18, %v408_v18  ;;  %v436_v22 = vld [vmem:[%s931_s16] sm:$0x3f]  ;;  %v417_v23 = vrot.slane %v408_v18, %v275_v9 }
  0x34   : > { %v389_v19 = vrot.slane %v382_v17, %v275_v9  ;;  %v438_v25 = vcombine.low %v436_v22, %v436_v22  ;;  %v267_v26 = vld [vmem:[%s931_s16] sm:$0x3f]  ;;  %v452_v29 = vrot.slane %v436_v22, %v275_v9 }
  0x35   : > { %v424_v24 = vrot.slane %v410_v21, %v275_v9  ;;  %v724_v27 = vld.sshfl [vmem:[%s931_s16] sm:$0x33 pattern:$0x76325410]  ;;  %v269_v30 = vcombine.low %v267_v26, %v267_v26  ;;  %v283_v32 = vrot.slane %v267_v26, %v275_v9 }
  0x36   : > { %266 = vst [vmem:[#allocation3 + $0x8] sm:$0x33] %v724_v27  ;;  %v445_v28 = vrot.slane %v438_v25, %v275_v9  ;;  %v296_v31 = vld [vmem:[%s931_s16] sm:$0x3f] }
  0x37   : > { %483 = vrot.lane.b32.xlu0 %v480_v15, %s853_s9  ;;  %371 = vrot.lane.b32.xlu1 %v368_v16, %s854_s10  ;;  %v276_v33 = vrot.slane %v269_v30, %v275_v9  ;;  %v298_v34 = vcombine.high %v296_v31, %v296_v31  ;;  %v324_v35 = vld [vmem:[%s931_s16] sm:$0x3f]  ;;  %v305_v37 = vrot.slane %v296_v31, %v275_v9 }
  0x38   : > { %v326_v38 = vcombine.low %v324_v35, %v324_v35  ;;  %v340_v39 = vrot.slane %v324_v35, %v275_v9 }
  0x39   : > { %v312_v36 = vrot.slane %v298_v34, %v275_v9  ;;  %v492_v34 = vld [vmem:[%s978_s1] sm:$0xf] }
  0x3a   : > { %v333_v40 = vrot.slane %v326_v38, %v275_v9 }
  0x3b   : > { %397 = vrot.lane.b32.xlu0 %v389_v19, %s855_s17  ;;  %399 = vrot.lane.b32.xlu1 %v396_v20, %s855_s17 }
  0x3f   : > { %425 = vrot.lane.b32.xlu0 %v417_v23, %s856_s6  ;;  %427 = vrot.lane.b32.xlu1 %v424_v24, %s856_s6 }
  0x43   : > { %453 = vrot.lane.b32.xlu0 %v445_v28, %s857_s7  ;;  %455 = vrot.lane.b32.xlu1 %v452_v29, %s857_s7 }
  0x47   : > { %286 = vrot.lane.b32.xlu1 %v283_v32, %s858_s8  ;;  %284 = vrot.lane.b32.xlu0 %v276_v33, %s858_s8 }
  0x4b   : > { %315 = vrot.lane.b32.xlu1 %v312_v36, %s859_s18  ;;  %313 = vrot.lane.b32.xlu0 %v305_v37, %s859_s18 }
  0x4f   : > { %343 = vrot.lane.b32.xlu1 %v340_v39, %s860_s19  ;;  %341 = vrot.lane.b32.xlu0 %v333_v40, %s860_s19 }
  0xa5   : > { %v482_v42 = vpop.permute.xlu0 %481  ;;  %v370_v43 = vpop.permute.xlu1 %369 }
  0xa6   : > { %v485_v46 = vrot.slane %v482_v42, 4  ;;  %v373_v47 = vrot.slane %v370_v43, 4 }
  0xa9   : > { %v484_v44 = vpop.permute.xlu0 %483  ;;  %v372_v45 = vpop.permute.xlu1 %371 }
  0xaa   : > { %v486_v48 = vrot.slane %v484_v44, 4  ;;  %v374_v49 = vrot.slane %v372_v45, 4 }
  0xac   : > { %v487_v50 = vsel %vm290_vm0, %v485_v46, %v486_v48  ;;  %v375_v51 = vsel %vm290_vm0, %v373_v47, %v374_v49 }
  0xad   : > { %v489_v52 = vsel %vm488_vm1, %v482_v42, %v487_v50  ;;  %v377_v53 = vsel %vm376_vm2, %v370_v43, %v375_v51  ;;  %v398_v54 = vpop.permute.xlu0 %397  ;;  %v400_v55 = vpop.permute.xlu1 %399 }
  0xae   : > { %491 = vst [vmem:[#allocation3 + $0x18] sm:$0x33] %v489_v52  ;;  %379 = vst [vmem:[#allocation3 + $0x20] sm:$0x33] %v377_v53  ;;  %v401_v56 = vrot.slane %v398_v54, 4  ;;  %v402_v57 = vrot.slane %v400_v55, 4 }
  0xb0   : > { %v403_v58 = vsel %vm290_vm0, %v401_v56, %v402_v57 }
  0xb1   : > { %v405_v59 = vsel %vm404_vm3, %v398_v54, %v403_v58  ;;  %v426_v60 = vpop.permute.xlu0 %425  ;;  %v428_v61 = vpop.permute.xlu1 %427 }
  0xb2   : > { %407 = vst [vmem:[#allocation3 + $0x20] sm:$0xcc] %v405_v59  ;;  %v429_v62 = vrot.slane %v426_v60, 4  ;;  %v430_v63 = vrot.slane %v428_v61, 4 }
  0xb4   : > { %v431_v0 = vsel %vm290_vm0, %v429_v62, %v430_v63 }
  0xb5   : > { %v433_v1 = vsel %vm432_vm4, %v426_v60, %v431_v0  ;;  %v454_v2 = vpop.permute.xlu0 %453  ;;  %v456_v3 = vpop.permute.xlu1 %455  ;;  %v497_v4 = vld [vmem:[#allocation3 + $0x18] sm:$0x33] }
  0xb6   : > { %435 = vst [vmem:[#allocation3 + $0x10] sm:$0x33] %v433_v1  ;;  %v457_v5 = vrot.slane %v454_v2, 4  ;;  %v458_v6 = vrot.slane %v456_v3, 4  ;;  %v730_v7 = vcombine.high %v497_v4, %v497_v4  ;;  %v729_v8 = vcombine.low %v497_v4, %v497_v4 }
  0xb8   : > { %v459_v9 = vsel %vm290_vm0, %v457_v5, %v458_v6  ;;  %731 = vmatprep.subr.msk.bf16.mxu0 %vm527_vm6, %v730_v7  ;;  %v529_v10 = vsel %vm527_vm6, %v729_v8, 0 }
  0xb9   : > { %v461_v11 = vsel %vm460_vm5, %v454_v2, %v459_v9  ;;  %545 = vmatpush1.bf16.msra.mxu0 %v529_v10  ;;  %v287_v12 = vpop.permute.xlu1 %286  ;;  %v285_v13 = vpop.permute.xlu0 %284 }
  0xba   : > { %463 = vst [vmem:[#allocation3 + $0x10] sm:$0xcc] %v461_v11  ;;  %v289_v14 = vrot.slane %v287_v12, 4  ;;  %v288_v15 = vrot.slane %v285_v13, 4 }
  0xbc   : > { %v291_v16 = vsel %vm290_vm0, %v288_v15, %v289_v14 }
  0xbd   : > { %v293_v17 = vsel %vm292_vm7, %v285_v13, %v291_v16  ;;  %v316_v18 = vpop.permute.xlu1 %315  ;;  %v314_v19 = vpop.permute.xlu0 %313 }
  0xbe   : > { %295 = vst [vmem:[#allocation3 + $0x8] sm:$0xcc] %v293_v17  ;;  %v318_v20 = vrot.slane %v316_v18, 4  ;;  %v317_v21 = vrot.slane %v314_v19, 4 }
  0xc0   : > { %v319_v22 = vsel %vm290_vm0, %v317_v21, %v318_v20 }
  0xc1   : > { %v321_v23 = vsel %vm320_vm8, %v314_v19, %v319_v22  ;;  %v344_v24 = vpop.permute.xlu1 %343  ;;  %v342_v25 = vpop.permute.xlu0 %341  ;;  %v804_v26 = vld [vmem:[#allocation3 + $0x24] ss:$-16 sps:$4 sm:$0xff]   ;;  %v806_v27 = vld [vmem:[#allocation3 + $0x20] ss:$-16 sps:$4 sm:$0xff]  }
  0xc2   : > { %323 = vst [vmem:[#allocation3] sm:$0x33] %v321_v23  ;;  %v346_v28 = vrot.slane %v344_v24, 4  ;;  %v345_v29 = vrot.slane %v342_v25, 4  ;;  %546 = vmatprep.subr.bf16.mxu0 %v804_v26 }
  0xc3   : > { %547 = vmatpush1.bf16.msra.mxu0 %v806_v27 }
  0xc4   : > { %v347_v30 = vsel %vm290_vm0, %v345_v29, %v346_v28 }
  0xc5   : > { %v349_v31 = vsel %vm348_vm9, %v342_v25, %v347_v30 }
  0xc6   : > { %351 = vst [vmem:[#allocation3] sm:$0xcc] %v349_v31 }
  0xcd   : > { %v807_v32 = vld [vmem:[#allocation3 + $0xc] ss:$-8 sps:$4 sm:$0xff]   ;;  %v809_v33 = vld [vmem:[#allocation3 + $0x8] ss:$-8 sps:$4 sm:$0xff]  }
  0xce   : > { %548 = vmatprep.subr.bf16.mxu0 %v807_v32 }
  0xcf   : > { %549 = vmatpush1.bf16.msra.mxu0 %v809_v33 }
  0xd2   : > { %732 = vmatmul.mubr.msk.bf16.vlgmr.msra.gmra.mxu0 %vm523_vm10, %v492_v34 }
 0x192   : > { %v568_v35 = vpop.f32.mrf.mxu0 }
 0x193   : > { %v575_v37 = vmax.f32 %v568_v35, 0.0 }
 0x194   : > { %v570_v36 = vpop.f32.mrf.mxu0 }
 0x195   : > { %v576_v38 = vmax.f32 %v570_v36, 0.0 }
 0x196   : > { %v572_v39 = vpop.f32.mrf.mxu0 }
 0x197   : > { %v743_v40 = vpack.c.bf16 %v576_v38, %v575_v37 }
 0x198   : > { %v573_v41 = vpop.f32.mrf.mxu0 }
 0x199   : > { %585 = vst [vmem:[%s920_s24] sm:$0xff] %v743_v40 }
 0x19a PF: > { %s12_s13 = sadd.s32 1, %s850_s13   ;;  %s980_s9 = smov %s842_s11 }
 0x19b   : > { %p9_p9 = scmp.ge.s32.totalorder %s12_s13, 6   ;;  %s981_s10 = smov %s846_s12 }
 0x19c   : > { %s982_s11 = smov %s985_s14  ;;  %s983_s12 = smov %s989_s15 }
 0x19d   :  { %11 = sbr.rel (!%p9_p9) target bundleno = 3 (0x3), region = 148 }
 0x1a2   :  { %616 = vsyncmov [#allocation4] }
 0x1a5   :  { %s617_s24 = vpop.sfrf %616 }
 0x1a6   :  { %p736_p10 = scmp.ne.s32.totalorder %s617_s24, 0 }
 0x1a8   :  { %621 = shalt.err (%p736_p10)  }
 0x1a9   :  { %623 = vsyncmov [#allocation4 + $0x1] }
 0x1ac   :  { %s624_s21 = vpop.sfrf %623 }
 0x1ad   :  { %p737_p11 = scmp.ne.s32.totalorder %s624_s21, 0 }
 0x1af   :  { %628 = shalt.err (%p737_p11)  }

</bundles_post_ra>
